<compile_context>
chip_gen: v7x
topology: tpu7x:2x2x1
jax: 0.10.0
libtpu: 0.0.40
codegen_flags: <defaults>
</compile_context>

<pallas_src>
import functools
import math

import jax
import jax.numpy as jnp
from jax.experimental import pallas as pl
from jax.experimental.pallas import tpu as pltpu


def _pick_tile(n, target):
    """Largest tile <= target dividing n that is a multiple of 8 (or n itself)."""
    if n <= target:
        return n
    for t in range(min(target, n), 7, -1):
        if n % t == 0 and t % 8 == 0:
            return t
    return n


# ---------------------------------------------------------------------------
# Projection kernel: one row-tile of tokens x a fully-resident weight.
# Operands stay in storage dtype; MXU accumulates in f32.
# ---------------------------------------------------------------------------
def _proj_kernel(x_ref, w_ref, o_ref):
    o_ref[...] = jnp.dot(x_ref[...], w_ref[...],
                         preferred_element_type=jnp.float32).astype(o_ref.dtype)


def _matmul(x2d, w_t, *, tm):
    M, D = x2d.shape
    N = w_t.shape[1]
    itemsize = jnp.dtype(x2d.dtype).itemsize
    cost = pl.CostEstimate(
        flops=2 * M * D * N,
        transcendentals=0,
        bytes_accessed=itemsize * (M * D + D * N + M * N),
    )
    return pl.pallas_call(
        _proj_kernel,
        out_shape=jax.ShapeDtypeStruct((M, N), x2d.dtype),
        grid_spec=pltpu.PrefetchScalarGridSpec(
            num_scalar_prefetch=0,
            grid=(M // tm,),
            in_specs=[
                pl.BlockSpec((tm, D), lambda i: (i, 0)),   # token-row tile
                pl.BlockSpec((D, N), lambda i: (0, 0)),    # resident weight
            ],
            out_specs=pl.BlockSpec((tm, N), lambda i: (i, 0)),
        ),
        compiler_params=pltpu.CompilerParams(
            dimension_semantics=("parallel",)),
        cost_estimate=cost,
    )(x2d, w_t)


# ---------------------------------------------------------------------------
# Causal flash-attention kernel (online softmax over kv tiles).
# Grid: (batch*heads, q tiles, kv tiles); kv axis is the reduction axis.
# ---------------------------------------------------------------------------
def _flash_attn_kernel(q_ref, k_ref, v_ref, o_ref, m_sc, l_sc, acc_sc,
                       *, scale, tq, tkv):
    qi = pl.program_id(1)
    ki = pl.program_id(2)

    @pl.when(ki == 0)
    def _():
        m_sc[...] = jnp.full(m_sc.shape, -jnp.inf, m_sc.dtype)
        l_sc[...] = jnp.zeros(l_sc.shape, l_sc.dtype)
        acc_sc[...] = jnp.zeros(acc_sc.shape, acc_sc.dtype)

    # Causal skip: only kv tiles that intersect the lower triangle for this q tile.
    @pl.when(ki * tkv <= qi * tq + (tq - 1))
    def _():
        q = q_ref[0]                                   # (tq, hd)
        k = k_ref[0]                                   # (tkv, hd)
        # q @ k^T without materializing a transpose: contract over head_dim.
        s = jax.lax.dot_general(
            q, k, (((1,), (1,)), ((), ())),
            preferred_element_type=jnp.float32) * scale          # (tq, tkv)

        q_pos = qi * tq + jax.lax.broadcasted_iota(jnp.int32, (tq, tkv), 0)
        k_pos = ki * tkv + jax.lax.broadcasted_iota(jnp.int32, (tq, tkv), 1)
        s = jnp.where(q_pos >= k_pos, s, -1e30)

        m_prev = m_sc[...]
        m_new = jnp.maximum(m_prev, jnp.max(s, axis=-1, keepdims=True))
        alpha = jnp.exp(m_prev - m_new)
        p = jnp.exp(s - m_new)
        l_sc[...] = alpha * l_sc[...] + jnp.sum(p, axis=-1, keepdims=True)
        acc_sc[...] = alpha * acc_sc[...] + jnp.dot(
            p.astype(v_ref.dtype), v_ref[0], preferred_element_type=jnp.float32)
        m_sc[...] = m_new

    @pl.when(ki == pl.num_programs(2) - 1)
    def _():
        o_ref[0] = (acc_sc[...] / l_sc[...]).astype(o_ref.dtype)


def _flash_attention(q, k, v, *, scale, tq, tkv):
    BH, S, hd = q.shape
    itemsize = jnp.dtype(q.dtype).itemsize
    cost = pl.CostEstimate(
        flops=4 * BH * S * S * hd,
        transcendentals=BH * S * S,
        bytes_accessed=itemsize * 4 * BH * S * hd,
    )
    kernel = functools.partial(_flash_attn_kernel, scale=scale, tq=tq, tkv=tkv)
    return pl.pallas_call(
        kernel,
        out_shape=jax.ShapeDtypeStruct((BH, S, hd), q.dtype),
        grid_spec=pltpu.PrefetchScalarGridSpec(
            num_scalar_prefetch=0,
            grid=(BH, S // tq, S // tkv),
            in_specs=[
                pl.BlockSpec((1, tq, hd), lambda bh, qi, ki: (bh, qi, 0)),
                pl.BlockSpec((1, tkv, hd), lambda bh, qi, ki: (bh, ki, 0)),
                pl.BlockSpec((1, tkv, hd), lambda bh, qi, ki: (bh, ki, 0)),
            ],
            out_specs=pl.BlockSpec((1, tq, hd), lambda bh, qi, ki: (bh, qi, 0)),
            scratch_shapes=[
                pltpu.VMEM((tq, 1), jnp.float32),    # running max
                pltpu.VMEM((tq, 1), jnp.float32),    # running sum
                pltpu.VMEM((tq, hd), jnp.float32),   # output accumulator
            ],
        ),
        compiler_params=pltpu.CompilerParams(
            dimension_semantics=("parallel", "parallel", "arbitrary")),
        cost_estimate=cost,
    )(q, k, v)


# ---------------------------------------------------------------------------
# Full module forward.
# ---------------------------------------------------------------------------
def mha_forward(x, wq, wk, wv, wo, *, n_heads, tm=256, tq=128, tkv=128):
    """x: [B, S, D]; wq/wk/wv/wo: [D, D] in PyTorch [out, in] layout."""
    B, S, D = x.shape
    assert D % n_heads == 0
    hd = D // n_heads
    M = B * S
    scale = 1.0 / math.sqrt(hd)

    # TODO(synk): pre-transpose / concatenate the weights once at parameter-load
    # time in a real model; done per-call here to stay self-contained.
    wqkv_t = jnp.concatenate([wq.T, wk.T, wv.T], axis=1)   # (D, 3D)
    wo_t = wo.T                                            # (D, D)

    tm = _pick_tile(M, tm)
    tq = _pick_tile(S, tq)
    tkv = _pick_tile(S, tkv)

    # 1) fused q/k/v projection: one wide GEMM.
    x2d = x.reshape(M, D)
    qkv = _matmul(x2d, wqkv_t, tm=tm)                      # (M, 3D)

    # 2) split heads (layout plumbing left to XLA).
    qkv = qkv.reshape(B, S, 3, n_heads, hd)
    q = qkv[:, :, 0].transpose(0, 2, 1, 3).reshape(B * n_heads, S, hd)
    k = qkv[:, :, 1].transpose(0, 2, 1, 3).reshape(B * n_heads, S, hd)
    v = qkv[:, :, 2].transpose(0, 2, 1, 3).reshape(B * n_heads, S, hd)

    # 3) causal flash attention.
    attn = _flash_attention(q, k, v, scale=scale, tq=tq, tkv=tkv)

    # 4) merge heads + output projection.
    attn2d = attn.reshape(B, n_heads, S, hd).transpose(0, 2, 1, 3).reshape(M, D)
    out2d = _matmul(attn2d, wo_t, tm=tm)

    # dropout / resid_dropout: identity in eval mode.
    return out2d.reshape(B, S, D)


# ---------------------------------------------------------------------------
# Pure-JAX reference (same math as the PyTorch module in eval mode, causal).
# ---------------------------------------------------------------------------
def _reference_mha(x, wq, wk, wv, wo, n_heads):
    B, S, D = x.shape
    hd = D // n_heads

    def split(t):
        return t.reshape(B, S, n_heads, hd).transpose(0, 2, 1, 3)

    q, k, v = split(x @ wq.T), split(x @ wk.T), split(x @ wv.T)
    scores = jnp.einsum("bhqd,bhkd->bhqk", q, k) / math.sqrt(hd)
    causal = jnp.tril(jnp.ones((S, S), dtype=bool))
    scores = jnp.where(causal[None, None], scores, -jnp.inf)
    attn = jax.nn.softmax(scores, axis=-1)
    out = jnp.einsum("bhqk,bhkd->bhqd", attn, v)
    out = out.transpose(0, 2, 1, 3).reshape(B, S, D)
    return out @ wo.T


if __name__ == "__main__":
    dim, n_heads = 128, 4          # head_dim = 32
    B, S = 2, 256

    key = jax.random.PRNGKey(0)
    kx, kq, kk, kvw, ko = jax.random.split(key, 5)

    x = jax.random.normal(kx, (B, S, dim), dtype=jnp.float32)

    bound = 1.0 / math.sqrt(dim)   # nn.Linear default uniform init, no bias
    wq = jax.random.uniform(kq, (dim, dim), jnp.float32, -bound, bound)
    wk = jax.random.uniform(kk, (dim, dim), jnp.float32, -bound, bound)
    wv = jax.random.uniform(kvw, (dim, dim), jnp.float32, -bound, bound)
    wo = jax.random.uniform(ko, (dim, dim), jnp.float32, -bound, bound)

    out = mha_forward(x, wq, wk, wv, wo, n_heads=n_heads)
    out = jax.block_until_ready(out)

    ref = _reference_mha(x, wq, wk, wv, wo, n_heads)
    assert out.shape == (B, S, dim)
    max_err = jnp.max(jnp.abs(out - ref))
    assert jnp.allclose(out, ref, atol=2e-3, rtol=2e-3), (
        f"mismatch vs reference, max abs err {max_err:.3e}")

    print("KERNEL_OK")
</pallas_src>

<mosaic_0001>
module attributes {stable_mosaic.version = 11 : i64} {
  func.func @_proj_kernel(%arg0: i32, %arg1: memref<256x128xf32, #tpu.memory_space<vmem>>, %arg2: memref<128x384xf32, #tpu.memory_space<vmem>>, %arg3: memref<256x384xf32, #tpu.memory_space<vmem>>) attributes {dimension_semantics = [#tpu.dimension_semantics<parallel>], iteration_bounds = array<i64: 2>, scalar_prefetch = 0 : i64, scratch_operands = 0 : i64, tpu.core_type = #tpu.core_type<tc>, window_params = [{transform_indices = @transform_0, window_bounds = array<i64: 256, 128>}, {pipeline_mode = #tpu.pipeline_mode<synchronous>, transform_indices = @transform_1, window_bounds = array<i64: 128, 384>}, {transform_indices = @transform_2, window_bounds = array<i64: 256, 384>}]} {
    %c0 = arith.constant 0 : index
    %c0_0 = arith.constant 0 : index
    %0 = vector.load %arg1[%c0, %c0_0] : memref<256x128xf32, #tpu.memory_space<vmem>>, vector<256x128xf32>
    %c0_1 = arith.constant 0 : index
    %c0_2 = arith.constant 0 : index
    %1 = vector.load %arg2[%c0_1, %c0_2] : memref<128x384xf32, #tpu.memory_space<vmem>>, vector<128x384xf32>
    %cst = arith.constant dense<0.000000e+00> : vector<256x384xf32>
    %2 = tpu.matmul %0, %1, %cst {dimension_numbers = #tpu.dot_dimension_numbers<[1], [0], [0], [1], [0, 0, 1, 1], [], []>} : vector<256x128xf32>, vector<128x384xf32>, vector<256x384xf32> -> vector<256x384xf32>
    %c0_3 = arith.constant 0 : index
    %c0_4 = arith.constant 0 : index
    %3 = vector.load %arg3[%c0_3, %c0_4] : memref<256x384xf32, #tpu.memory_space<vmem>>, vector<256x384xf32>
    tpu.vector_store %arg3[%c0_3, %c0_4], %2 {strides = array<i32>} : memref<256x384xf32, #tpu.memory_space<vmem>>, vector<256x384xf32>,
    return
  }
  func.func @transform_0(%arg0: i32) -> (i32, i32) {
    %c0_i32 = arith.constant 0 : i32
    %c0_i32_0 = arith.constant 0 : i32
    return %arg0, %c0_i32 : i32, i32
  }
  func.func @transform_1(%arg0: i32) -> (i32, i32) {
    %c0_i32 = arith.constant 0 : i32
    %c0_i32_0 = arith.constant 0 : i32
    %c0_i32_1 = arith.constant 0 : i32
    return %c0_i32, %c0_i32_0 : i32, i32
  }
  func.func @transform_2(%arg0: i32) -> (i32, i32) {
    %c0_i32 = arith.constant 0 : i32
    %c0_i32_0 = arith.constant 0 : i32
    return %arg0, %c0_i32 : i32, i32
  }
}

</mosaic_0001>

<bundles_post_ra>
// kernel: tpu_custom_call.1
= control target key start
LH: loop header
LB: loop body
LE: loop exit
PB: predicated region body
PF: predicated region fallthrough
CT: control target
= control target key end

     0   :  { %7 = vsyncpa [#allocation3], 0  ;;  %s1791_s0 = inlined_call_operand.hbm [shape: f32[512,128], index: 0, kind: input, shape index: {}]   ;;  %s1792_s1 = inlined_call_operand.hbm [shape: f32[128,384], index: 1, kind: input, shape index: {}]   ;;  %s1793_s2 = inlined_call_operand.hbm [shape: f32[512,384], index: 2, kind: output, shape index: {}]  }
   0x1   :  { %9 = vsyncpa [#allocation3 + $0x1], 0 }
   0x2   :  { %10 = vsyncpa [#allocation6], 0 }
   0x3   :  { %11 = vsyncpa [#allocation4], 0 }
   0x4   :  { %13 = vsyncpa [#allocation4 + $0x1], 0  ;;  %s1380_s9 = smov 0   ;;  %s1382_s10 = smov 0  }
   0x5   :  { %s1384_s11 = smov 0   ;;  %s1386_s12 = smov 0  }
   0x6 LB: > { %s1401_s13 = sadd.s32 4294967295, %s1353_s12   ;;  %s935_s14 = sadd.s32 4294967294, %s1353_s12   ;;  %s1353_s12 = sphi %s1386_s12, %s1813_s12   ;;  %s1349_s11 = sphi %s1384_s11, %s1812_s11   ;;  %s1345_s10 = sphi %s1382_s10, %s1811_s10   ;;  %s1341_s9 = sphi %s1380_s9, %s1810_s9  }
   0x7   : > { %p39_p0 = scmp.ne.s32.totalorder %s1345_s10, %s1341_s9  ;;  %p1794_p1 = scmp.eq.s32.totalorder %s1401_s13, 0 }
   0x8   : > { %p90_p3 = scmp.eq.s32.totalorder %s935_s14, 1  ;;  %p936_p5 = scmp.ge.s32.totalorder %s1353_s12, 1 }
   0x9   : > { %p1410_p4 = por %p1794_p1, %p39_p0  ;;  %p97_p7 = scmp.lt.s32.totalorder %s1353_s12, 3 }
   0xa   : > { %p1415_p6 = por %p90_p3, %p39_p0  ;;  %s1355_s18 = smov [#allocation5]  }
   0xb   : > { %s1797_s15 = scalar_select %p1410_p4, 1, 0 }
   0xc   : > { %s1798_s16 = scalar_select %p1415_p6, 1, 0 }
   0xd   : > { %p1420_p8 = pnand %p936_p5, %p97_p7  ;;  %s109_s19 = sshll.u32 %s1355_s18, 4  ;;  %s1424_s19 = int_to_ptr.vmem [resolvable:$true] %s109_s19 }
   0xe   : > { %s1436_s21 = sadd.s32 1, %s1353_s12   ;;  %s26_s22 = sadd.s32 1, %s1349_s11 }
   0xf   : > { %s1799_s17 = scalar_select %p1420_p8, 1, 0 }
  0x10   : > { %p1169_p9 = pneg %p1420_p8  ;;  %s23_s23 = ssub.s32 %s1353_s12, %s1436_s21 }
  0x11   : > { %s1225_s26 = scalar_lea.hbm %s1792_s1, 6144 }
  0x12   : > { %p1431_p11 = pnand %p1169_p9, %p1794_p1  ;;  %p1226_p12 = scmp.ne.s32.totalorder %s1792_s1, %s1225_s26 }
  0x13   : > { %p1232_p5 = scmp.lt.u32.totalorder %s1225_s26, %s1792_s1 }
  0x14   : > { %p1227_p13 = pneg %p1431_p11 }
  0x16   : > { %p1228_p0 = pnand %p1227_p13, %p1226_p12 }
  0x18   : > { %p1229_p3 = pneg %p1228_p0 }
  0x1a   : > { %p1234_p7 = pnand %p1232_p5, %p1229_p3 }
  0x1c   : > { %1237 = shalt.err (!%p1234_p7)
}
  0x1d   : > { %s1238_s3 = scalar_lea.vmem %s1424_s19, 6144  ;;  %p1246_p2 = scmp.lt.s32.totalorder %s1424_s19, %s1424_s19 }
  0x1e   : > { %p1239_p9 = scmp.ne.s32.totalorder %s1424_s19, %s1238_s3  ;;  %p1247_p6 = scmp.lt.s32.totalorder %s1238_s3, %s1238_s3 }
  0x20   : > { %p1241_p10 = pnand %p1239_p9, %p1227_p13  ;;  %p1248_p4 = por %p1247_p6, %p1246_p2 }
  0x22   : > { %p1242_p1 = pneg %p1241_p10 }
  0x24   : > { %p1249_p8 = pnand %p1248_p4, %p1242_p1 }
  0x26   : > { %1252 = shalt.err (!%p1249_p8)
}
  0x27   : > { %s1356_s4 = smov 384   ;;  %s1357_s5 = smov 24  }
  0x28   : > { %1172 = dma.hbm_to_vmem [thread:$0]  (!%p1431_p11), %s1792_s1, 6144, %s1424_s19, [#allocation6], %s1356_s4, %s1356_s4, %s1357_s5  }
  0x29   : > { %p24_p2 = scmp.eq.s32.totalorder %s23_s23, 0  ;;  %p33_p1 = scmp.ne.s32.totalorder %s1349_s11, %s1345_s10 }
  0x2a   : > { %p34_p4 = scmp.eq.s32.totalorder %s1353_s12, 0  ;;  %p1182_p6 = scmp.lt.s32.totalorder %s1353_s12, 2 }
  0x2b   : > { %s1467_s8 = scalar_select %p24_p2, %s1349_s11, %s26_s22  }
  0x2c   : > { %p35_p8 = por %p34_p4, %p33_p1  ;;  %p1801_p10 = scmp.eq.s32.totalorder %s1401_s13, 1 }
  0x2d   : > { %s123_s18 = sand.u32 1, %s1349_s11   ;;  %s950_s24 = sshll.u32 %s1353_s12, 12 }
  0x2e   : > { %p1471_p12 = por %p1801_p10, %p33_p1  ;;  %s939_s25 = sshll.u32 %s123_s18, 8 }
  0x2f   : > { %s1480_s27 = scalar_lea.hbm %s1791_s0, %s950_s24  ;;  %s127_s19 = scalar_lea.vmem [#allocation2], %s939_s25 }
  0x30   : > { %s134_s22 = sshll.u32 %s127_s19, 4  ;;  %p1482_p11 = pnand %p1182_p6, %p35_p8  ;;  %s1486_s22 = int_to_ptr.vmem [resolvable:$true] %s134_s22 }
  0x31   : > { %s1488_s28 = scalar_lea.sflag [#allocation3], %s123_s18  ;;  %s1253_s29 = scalar_lea.hbm %s1480_s27, 4096 }
  0x32   : > { %p1254_p13 = scmp.ne.s32.totalorder %s1480_s27, %s1253_s29  ;;  %p1255_p0 = pneg %p1482_p11 }
  0x33   : > { %s1258_s4 = scalar_lea.hbm %s1791_s0, 8192  ;;  %p1259_p7 = scmp.lt.u32.totalorder %s1480_s27, %s1791_s0 }
  0x34   : > { %p1256_p3 = pnand %p1255_p0, %p1254_p13  ;;  %p1260_p9 = scmp.lt.u32.totalorder %s1258_s4, %s1253_s29 }
  0x35   : > { %p1262_p1 = scmp.lt.u32.totalorder %s1253_s29, %s1480_s27 }
  0x36   : > { %p1257_p5 = pneg %p1256_p3  ;;  %p1261_p2 = por %p1260_p9, %p1259_p7 }
  0x38   : > { %p1263_p4 = por %p1262_p1, %p1261_p2 }
  0x3a   : > { %p1264_p6 = pnand %p1263_p4, %p1257_p5 }
  0x3c   : > { %1267 = shalt.err (!%p1264_p6)
}
  0x3d   : > { %s1268_s7 = scalar_lea.vmem %s1486_s22, 4096  ;;  %s1358_s18 = smov [#allocation2]  }
  0x3e   : > { %p1269_p8 = scmp.ne.s32.totalorder %s1486_s22, %s1268_s7  ;;  %s1273_s24 = sshll.u32 %s1358_s18, 4  ;;  %s1274_s24 = int_to_ptr.vmem [resolvable:$false] %s1273_s24 }
  0x3f   : > { %s1275_s25 = scalar_lea.vmem %s1274_s24, 8192  ;;  %p1276_p3 = scmp.lt.s32.totalorder %s1486_s22, %s1274_s24 }
  0x40   : > { %p1271_p10 = pnand %p1269_p8, %p1255_p0  ;;  %p1277_p7 = scmp.lt.s32.totalorder %s1275_s25, %s1268_s7 }
  0x42   : > { %p1272_p13 = pneg %p1271_p10  ;;  %p1278_p9 = por %p1277_p7, %p1276_p3 }
  0x44   : > { %p1279_p2 = pnand %p1278_p9, %p1272_p13 }
  0x46   : > { %1282 = shalt.err (!%p1279_p2)
}
  0x47   : > { %s1359_s20 = smov 128   ;;  %s1360_s26 = smov 8  }
  0x48   : > { %1176 = dma.hbm_to_vmem [thread:$0]  (!%p1482_p11), %s1480_s27, 4096, %s1486_s22, %s1488_s28, %s1359_s20, %s1359_s20, %s1360_s26  }
  0x49   : > { %p1804_p0 = scmp.ne.s32.totalorder %s1799_s17, 0 }
  0x4a   : > { %s1519_s19 = sand.u32 (!%p1804_p0), 1, %s1345_s10   ;;  %p1805_p5 = scmp.ne.s32.totalorder (!%p1804_p0), %s1797_s15, 0 }
  0x4b   : > { %146 = sbr.rel (%p1804_p0) target bundleno = 441 (0x1b9), region = 28  ;;  %s943_s29 = sshll.u32 (!%p1804_p0), %s1519_s19, 8 }
  0x4c   : > { %s149_s30 = scalar_lea.sflag (!%p1804_p0), [#allocation3], %s1519_s19  ;;  %s1523_s3 = scalar_lea.vmem (!%p1804_p0), [#allocation2], %s943_s29 }
  0x52   : > { %1328 = dma.done.wait (%p1805_p5), %s149_s30, 4096  }
  0x53   : > { %1330 = vsyncadd (%p1805_p5), %s149_s30, 4294963200  ;;  %p1806_p11 = scmp.eq.s32.totalorder %s1401_s13, 0 }
  0x55   : > { %1332 = dma.done.wait (%p1806_p11), [#allocation6], 6144   ;;  %p1807_p1 = pmov %p1806_p11 }
  0x56   : > { %v1361_v0 = vmov 0.0   ;;  %v212_v1 = vld [vmem:[#allocation5 + $0x8] sm:$0xff]  ;;  %v215_v2 = vld [vmem:[#allocation5 + $0x20] sm:$0xff]  ;;  %v214_v5 = vld [vmem:[#allocation5 + $0x18] sm:$0xff]  ;;  %s1159_s15 = smul.u32 768, %s1519_s19  ;;  %s1362_s6 = smov [#allocation7]  }
  0x57   : > { %1334 = vsyncadd (%p1807_p1), [#allocation6], 4294961152  ;;  %323 = vmatprep.mubr.f32.mxu0 %v1361_v0  ;;  %467 = vmatprep.mubr.f32.mxu1 %v1361_v0  ;;  %v211_v3 = vld [vmem:[#allocation5] sm:$0xff]  ;;  %v1079_v4 = vpack.c.bf16 %v215_v2, %v212_v1  ;;  %v218_v6 = vld [vmem:[#allocation5 + $0x38] sm:$0xff]  ;;  %s1160_s27 = smul.u32 12288, %s1401_s13  ;;  %s838_s13 = scalar_lea.sflag [#allocation4], %s1519_s19 }
  0x58   : > { %v221_v7 = vld [vmem:[#allocation5 + $0x50] sm:$0xff]  ;;  %v1081_v8 = vpack.c.bf16 %v214_v5, %v211_v3  ;;  %v220_v11 = vld [vmem:[#allocation5 + $0x48] sm:$0xff]  ;;  %v227_v13 = vld [vmem:[#allocation5 + $0x80] sm:$0xff]  ;;  %s1642_s17 = scalar_lea.vmem [#allocation7], %s1159_s15  ;;  %s1287_s7 = sshll.u32 %s1362_s6, 4  ;;  %s1288_s7 = int_to_ptr.vmem [resolvable:$false] %s1287_s7 }
  0x59   : > { %v1083_v9 = vpack.c.bf16 %v221_v7, %v218_v6  ;;  %v217_v10 = vld [vmem:[#allocation5 + $0x30] sm:$0xff]  ;;  %v224_v12 = vld [vmem:[#allocation5 + $0x68] sm:$0xff]  ;;  %1080 = vmatprep.subr.bf16.mxu0 %v1079_v4  ;;  %1143 = vmatprep.subr.bf16.mxu1 %v1079_v4  ;;  %v223_v16 = vld [vmem:[#allocation5 + $0x60] sm:$0xff]  ;;  %s852_s22 = sshll.u32 %s1642_s17, 4  ;;  %s1741_s4 = scalar_lea.hbm %s1793_s2, %s1160_s27  ;;  %s1743_s22 = int_to_ptr.vmem [resolvable:$true] %s852_s22 }
  0x5a   : > { %1082 = vmatpush1.bf16.msra.mxu0 %v1081_v8  ;;  %1151 = vmatpush1.bf16.msra.mxu1 %v1081_v8  ;;  %v1085_v14 = vpack.c.bf16 %v220_v11, %v217_v10  ;;  %v1087_v15 = vpack.c.bf16 %v227_v13, %v224_v12  ;;  %v226_v17 = vld [vmem:[#allocation5 + $0x78] sm:$0xff]  ;;  %v233_v19 = vld [vmem:[#allocation5 + $0xb0] sm:$0xff]  ;;  %v232_v23 = vld [vmem:[#allocation5 + $0xa8] sm:$0xff]  ;;  %s1283_s5 = scalar_lea.vmem %s1743_s22, 12288  ;;  %s1289_s18 = scalar_lea.vmem %s1288_s7, 24576 }
  0x5b   : > { %1084 = vmatprep.subr.bf16.mxu0 %v1083_v9  ;;  %1144 = vmatprep.subr.bf16.mxu1 %v1083_v9  ;;  %v230_v18 = vld [vmem:[#allocation5 + $0x98] sm:$0xff]  ;;  %v1089_v20 = vpack.c.bf16 %v226_v17, %v223_v16  ;;  %v229_v22 = vld [vmem:[#allocation5 + $0x90] sm:$0xff]  ;;  %v236_v24 = vld [vmem:[#allocation5 + $0xc8] sm:$0xff]  ;;  %p1284_p4 = scmp.ne.s32.totalorder %s1743_s22, %s1283_s5  ;;  %p1290_p10 = scmp.lt.s32.totalorder %s1743_s22, %s1288_s7 }
  0x5c   : > { %v1091_v21 = vpack.c.bf16 %v233_v19, %v230_v18  ;;  %v239_v25 = vld [vmem:[#allocation5 + $0xe0] sm:$0xff]  ;;  %v1093_v26 = vpack.c.bf16 %v232_v23, %v229_v22  ;;  %v238_v29 = vld [vmem:[#allocation5 + $0xd8] sm:$0xff]  ;;  %v245_v31 = vld [vmem:[#allocation5 + $0x110] sm:$0xff]  ;;  %p1291_p13 = scmp.lt.s32.totalorder %s1289_s18, %s1283_s5 }
  0x5d   : > { %v1095_v27 = vpack.c.bf16 %v239_v25, %v236_v24  ;;  %v235_v28 = vld [vmem:[#allocation5 + $0xc0] sm:$0xff]  ;;  %v242_v30 = vld [vmem:[#allocation5 + $0xf8] sm:$0xff]  ;;  %v241_v34 = vld [vmem:[#allocation5 + $0xf0] sm:$0xff]  ;;  %p1285_p6 = pnand %p1284_p4, %p1471_p12 }
  0x5e   : > { %1086 = vmatpush1.bf16.msra.mxu0 %v1085_v14  ;;  %1152 = vmatpush1.bf16.msra.mxu1 %v1085_v14  ;;  %v1097_v32 = vpack.c.bf16 %v238_v29, %v235_v28  ;;  %v1099_v33 = vpack.c.bf16 %v245_v31, %v242_v30  ;;  %v244_v35 = vld [vmem:[#allocation5 + $0x108] sm:$0xff]  ;;  %v251_v37 = vld [vmem:[#allocation5 + $0x140] sm:$0xff]  ;;  %v250_v41 = vld [vmem:[#allocation5 + $0x138] sm:$0xff]  ;;  %p1292_p3 = por %p1291_p13, %p1290_p10 }
  0x5f   : > { %1088 = vmatprep.subr.bf16.mxu0 %v1087_v15  ;;  %1145 = vmatprep.subr.bf16.mxu1 %v1087_v15  ;;  %v248_v36 = vld [vmem:[#allocation5 + $0x128] sm:$0xff]  ;;  %v1101_v38 = vpack.c.bf16 %v244_v35, %v241_v34  ;;  %v247_v40 = vld [vmem:[#allocation5 + $0x120] sm:$0xff]  ;;  %v254_v42 = vld [vmem:[#allocation5 + $0x158] sm:$0xff]  ;;  %p1286_p8 = pneg %p1285_p6 }
  0x60   : > { %v1103_v39 = vpack.c.bf16 %v251_v37, %v248_v36  ;;  %v257_v43 = vld [vmem:[#allocation5 + $0x170] sm:$0xff]  ;;  %v1105_v44 = vpack.c.bf16 %v250_v41, %v247_v40  ;;  %v256_v47 = vld [vmem:[#allocation5 + $0x168] sm:$0xff]  ;;  %v219_v52 = vld [vmem:[#allocation5 + $0x40] sm:$0xff] }
  0x61   : > { %v1107_v45 = vpack.c.bf16 %v257_v43, %v254_v42  ;;  %v253_v46 = vld [vmem:[#allocation5 + $0x150] sm:$0xff]  ;;  %v216_v49 = vld [vmem:[#allocation5 + $0x28] sm:$0xff]  ;;  %v222_v53 = vld [vmem:[#allocation5 + $0x58] sm:$0xff]  ;;  %p1293_p7 = pnand %p1292_p3, %p1286_p8 }
  0x62   : > { %1090 = vmatpush1.bf16.msra.mxu0 %v1089_v20  ;;  %1153 = vmatpush1.bf16.msra.mxu1 %v1089_v20  ;;  %v213_v48 = vld [vmem:[#allocation5 + $0x10] sm:$0xff]  ;;  %v1109_v50 = vpack.c.bf16 %v256_v47, %v253_v46  ;;  %v1536_v54 = vld [vmem:[%s1523_s3] sm:$0xff]  ;;  %v1115_v56 = vpack.c.bf16 %v222_v53, %v219_v52  ;;  %v228_v58 = vld [vmem:[#allocation5 + $0x88] sm:$0xff] }
  0x63   : > { %1092 = vmatprep.subr.bf16.mxu0 %v1091_v21  ;;  %1146 = vmatprep.subr.bf16.mxu1 %v1091_v21  ;;  %v1111_v51 = vpack.c.bf16 %v216_v49, %v213_v48  ;;  %v1539_v55 = vld [vmem:[%s1523_s3 + $0xc0] sm:$0xff]  ;;  %v225_v57 = vld [vmem:[#allocation5 + $0x70] sm:$0xff]  ;;  %v1545_v59 = vld [vmem:[%s1523_s3 + $0x8] sm:$0xff] }
  0x64   : > { %v1548_v60 = vld [vmem:[%s1523_s3 + $0xc8] sm:$0xff]  ;;  %v1119_v61 = vpack.c.bf16 %v228_v58, %v225_v57  ;;  %v231_v62 = vld [vmem:[#allocation5 + $0xa0] sm:$0xff]  ;;  %v234_v63 = vld [vmem:[#allocation5 + $0xb8] sm:$0xff] }
  0x65   : > { %v1555_v1 = vld [vmem:[%s1523_s3 + $0x10] sm:$0xff]  ;;  %v1123_v3 = vpack.c.bf16 %v234_v63, %v231_v62  ;;  %v240_v5 = vld [vmem:[#allocation5 + $0xe8] sm:$0xff]  ;;  %v182_v6 = vld [vmem:[%s1523_s3 + $0x18] sm:$0xff] }
  0x66   : > { %1094 = vmatpush1.bf16.msra.mxu0 %v1093_v26  ;;  %1154 = vmatpush1.bf16.msra.mxu1 %v1093_v26  ;;  %v1558_v2 = vld [vmem:[%s1523_s3 + $0xd0] sm:$0xff]  ;;  %v1566_v7 = vld [vmem:[%s1523_s3 + $0xd8] sm:$0xff]  ;;  %v243_v9 = vld [vmem:[#allocation5 + $0x100] sm:$0xff] }
  0x67   : > { %1096 = vmatprep.subr.bf16.mxu0 %v1095_v27  ;;  %1147 = vmatprep.subr.bf16.mxu1 %v1095_v27  ;;  %v237_v4 = vld [vmem:[#allocation5 + $0xd0] sm:$0xff]  ;;  %v246_v10 = vld [vmem:[#allocation5 + $0x118] sm:$0xff]  ;;  %v183_v11 = vld [vmem:[%s1523_s3 + $0x20] sm:$0xff] }
  0x68   : > { %v1127_v8 = vpack.c.bf16 %v240_v5, %v237_v4  ;;  %v1573_v12 = vld [vmem:[%s1523_s3 + $0xe0] sm:$0xff]  ;;  %v1131_v13 = vpack.c.bf16 %v246_v10, %v243_v9  ;;  %v249_v14 = vld [vmem:[#allocation5 + $0x130] sm:$0xff]  ;;  %v252_v15 = vld [vmem:[#allocation5 + $0x148] sm:$0xff] }
  0x69   : > { %v184_v16 = vld [vmem:[%s1523_s3 + $0x28] sm:$0xff]  ;;  %v1135_v18 = vpack.c.bf16 %v252_v15, %v249_v14  ;;  %v255_v19 = vld [vmem:[#allocation5 + $0x160] sm:$0xff]  ;;  %v258_v20 = vld [vmem:[#allocation5 + $0x178] sm:$0xff] }
  0x6a   : > { %1098 = vmatpush1.bf16.msra.mxu0 %v1097_v32  ;;  %1155 = vmatpush1.bf16.msra.mxu1 %v1097_v32  ;;  %v1580_v17 = vld [vmem:[%s1523_s3 + $0xe8] sm:$0xff]  ;;  %v185_v21 = vld [vmem:[%s1523_s3 + $0x30] sm:$0xff]  ;;  %v1139_v23 = vpack.c.bf16 %v258_v20, %v255_v19  ;;  %v186_v24 = vld [vmem:[%s1523_s3 + $0x38] sm:$0xff] }
  0x6b   : > { %1100 = vmatprep.subr.bf16.mxu0 %v1099_v33  ;;  %1148 = vmatprep.subr.bf16.mxu1 %v1099_v33  ;;  %v1587_v22 = vld [vmem:[%s1523_s3 + $0xf0] sm:$0xff]  ;;  %v1594_v25 = vld [vmem:[%s1523_s3 + $0xf8] sm:$0xff]  ;;  %v187_v26 = vld [vmem:[%s1523_s3 + $0x40] sm:$0xff] }
  0x6c   : > { %v188_v27 = vld [vmem:[%s1523_s3 + $0x48] sm:$0xff]  ;;  %v189_v28 = vld [vmem:[%s1523_s3 + $0x50] sm:$0xff]  ;;  %v190_v29 = vld [vmem:[%s1523_s3 + $0x58] sm:$0xff] }
  0x6d   : > { %v191_v30 = vld [vmem:[%s1523_s3 + $0x60] sm:$0xff]  ;;  %v192_v31 = vld [vmem:[%s1523_s3 + $0x68] sm:$0xff]  ;;  %v193_v32 = vld [vmem:[%s1523_s3 + $0x70] sm:$0xff] }
  0x6e   : > { %1102 = vmatpush1.bf16.msra.mxu0 %v1101_v38  ;;  %1156 = vmatpush1.bf16.msra.mxu1 %v1101_v38  ;;  %v194_v33 = vld [vmem:[%s1523_s3 + $0x78] sm:$0xff]  ;;  %v195_v34 = vld [vmem:[%s1523_s3 + $0x80] sm:$0xff]  ;;  %v196_v35 = vld [vmem:[%s1523_s3 + $0x88] sm:$0xff] }
  0x6f   : > { %1104 = vmatprep.subr.bf16.mxu0 %v1103_v39  ;;  %1149 = vmatprep.subr.bf16.mxu1 %v1103_v39  ;;  %v197_v36 = vld [vmem:[%s1523_s3 + $0x90] sm:$0xff]  ;;  %v198_v37 = vld [vmem:[%s1523_s3 + $0x98] sm:$0xff]  ;;  %v199_v38 = vld [vmem:[%s1523_s3 + $0xa0] sm:$0xff] }
  0x70   : > { %v200_v39 = vld [vmem:[%s1523_s3 + $0xa8] sm:$0xff]  ;;  %v201_v40 = vld [vmem:[%s1523_s3 + $0xb0] sm:$0xff]  ;;  %v202_v41 = vld [vmem:[%s1523_s3 + $0xb8] sm:$0xff] }
  0x72   : > { %1106 = vmatpush1.bf16.msra.mxu0 %v1105_v44  ;;  %1157 = vmatpush1.bf16.msra.mxu1 %v1105_v44 }
  0x73   : > { %1108 = vmatprep.subr.bf16.mxu0 %v1107_v45  ;;  %1150 = vmatprep.subr.bf16.mxu1 %v1107_v45 }
  0x76   : > { %1110 = vmatpush1.bf16.msra.mxu0 %v1109_v50  ;;  %1158 = vmatpush1.bf16.msra.mxu1 %v1109_v50 }
  0x77   : > { %1112 = vmatprep.subr.bf16.mxu1 %v1111_v51 }
  0x79   : > { %324 = vmatmul.mubr.f32.vlgmr.msra.gmra.mrb[0].mxu0 %v1536_v54  ;;  %468 = vmatmul.mubr.f32.vlgmr.msra.gmra.mrb[0].mxu1 %v1539_v55 }
  0x7a   : > { %1114 = vmatpush3.bf16.msra.mxu1 %v1111_v51  ;;  %329 = vmatprep.mubr.f32.mxu0 %v1361_v0 }
  0x7b   : > { %473 = vmatprep.mubr.f32.mxu1 %v1361_v0  ;;  %1116 = vmatprep.subr.bf16.mxu1 %v1115_v56 }
  0x7d   : > { %330 = vmatmul.mubr.f32.gmra.mrb[2].mxu0 %v1545_v59  ;;  %474 = vmatmul.mubr.f32.gmra.mrb[2].mxu1 %v1548_v60 }
  0x7e   : > { %1118 = vmatpush3.bf16.msra.mxu1 %v1115_v56  ;;  %335 = vmatprep.mubr.f32.mxu0 %v1361_v0 }
  0x7f   : > { %479 = vmatprep.mubr.f32.mxu1 %v1361_v0  ;;  %1120 = vmatprep.subr.bf16.mxu1 %v1119_v61 }
  0x81   : > { %336 = vmatmul.mubr.f32.gmra.mrb[4].mxu0 %v1555_v1  ;;  %480 = vmatmul.mubr.f32.gmra.mrb[4].mxu1 %v1558_v2 }
  0x82   : > { %1122 = vmatpush3.bf16.msra.mxu1 %v1119_v61  ;;  %341 = vmatprep.mubr.f32.mxu0 %v1361_v0 }
  0x83   : > { %485 = vmatprep.mubr.f32.mxu1 %v1361_v0  ;;  %1124 = vmatprep.subr.bf16.mxu1 %v1123_v3 }
  0x85   : > { %342 = vmatmul.mubr.f32.gmra.mrb[6].mxu0 %v182_v6  ;;  %486 = vmatmul.mubr.f32.gmra.mrb[6].mxu1 %v1566_v7 }
  0x86   : > { %1126 = vmatpush3.bf16.msra.mxu1 %v1123_v3  ;;  %347 = vmatprep.mubr.f32.mxu0 %v1361_v0 }
  0x87   : > { %491 = vmatprep.mubr.f32.mxu1 %v1361_v0  ;;  %1128 = vmatprep.subr.bf16.mxu1 %v1127_v8 }
  0x89   : > { %348 = vmatmul.mubr.f32.gmra.mrb[8].mxu0 %v183_v11  ;;  %492 = vmatmul.mubr.f32.gmra.mrb[8].mxu1 %v1573_v12 }
  0x8a   : > { %1130 = vmatpush3.bf16.msra.mxu1 %v1127_v8  ;;  %353 = vmatprep.mubr.f32.mxu0 %v1361_v0 }
  0x8b   : > { %497 = vmatprep.mubr.f32.mxu1 %v1361_v0  ;;  %1132 = vmatprep.subr.bf16.mxu1 %v1131_v13 }
  0x8d   : > { %354 = vmatmul.mubr.f32.gmra.mrb[10].mxu0 %v184_v16  ;;  %498 = vmatmul.mubr.f32.gmra.mrb[10].mxu1 %v1580_v17 }
  0x8e   : > { %1134 = vmatpush3.bf16.msra.mxu1 %v1131_v13  ;;  %359 = vmatprep.mubr.f32.mxu0 %v1361_v0 }
  0x8f   : > { %503 = vmatprep.mubr.f32.mxu1 %v1361_v0  ;;  %1136 = vmatprep.subr.bf16.mxu1 %v1135_v18 }
  0x91   : > { %360 = vmatmul.mubr.f32.gmra.mrb[12].mxu0 %v185_v21  ;;  %504 = vmatmul.mubr.f32.gmra.mrb[12].mxu1 %v1587_v22 }
  0x92   : > { %1138 = vmatpush3.bf16.msra.mxu1 %v1135_v18  ;;  %365 = vmatprep.mubr.f32.mxu0 %v1361_v0 }
  0x93   : > { %509 = vmatprep.mubr.f32.mxu1 %v1361_v0  ;;  %1140 = vmatprep.subr.bf16.mxu1 %v1139_v23 }
  0x95   : > { %366 = vmatmul.mubr.f32.gmra.mrb[14].mxu0 %v186_v24  ;;  %510 = vmatmul.mubr.f32.gmra.mrb[14].mxu1 %v1594_v25 }
  0x96   : > { %1142 = vmatpush3.bf16.msra.mxu1 %v1139_v23  ;;  %371 = vmatprep.mubr.f32.mxu0 %v1361_v0 }
  0x97   : > { %1031 = vmatprep.mubr.f32.mxu1 %v1536_v54 }
  0x99   : > { %372 = vmatmul.mubr.f32.gmra.mrb[16].mxu0 %v187_v26  ;;  %1032 = vmatmul.mubr.f32.vlgmr.msra.gmra.mrb[16].mxu1 %v1545_v59 }
  0x9a   : > { %377 = vmatprep.mubr.f32.mxu0 %v1361_v0  ;;  %1034 = vmatprep.mubr.f32.mxu1 %v1555_v1 }
  0x9d   : > { %378 = vmatmul.mubr.f32.gmra.mrb[18].mxu0 %v188_v27  ;;  %1035 = vmatmul.mubr.f32.gmra.mrb[18].mxu1 %v182_v6 }
  0x9e   : > { %383 = vmatprep.mubr.f32.mxu0 %v1361_v0  ;;  %1037 = vmatprep.mubr.f32.mxu1 %v183_v11 }
  0xa1   : > { %384 = vmatmul.mubr.f32.gmra.mrb[20].mxu0 %v189_v28  ;;  %1038 = vmatmul.mubr.f32.gmra.mrb[20].mxu1 %v184_v16 }
  0xa2   : > { %389 = vmatprep.mubr.f32.mxu0 %v1361_v0  ;;  %1040 = vmatprep.mubr.f32.mxu1 %v185_v21 }
  0xa5   : > { %390 = vmatmul.mubr.f32.gmra.mrb[22].mxu0 %v190_v29  ;;  %1041 = vmatmul.mubr.f32.gmra.mrb[22].mxu1 %v186_v24 }
  0xa6   : > { %395 = vmatprep.mubr.f32.mxu0 %v1361_v0  ;;  %1043 = vmatprep.mubr.f32.mxu1 %v187_v26 }
  0xa9   : > { %396 = vmatmul.mubr.f32.gmra.mrb[24].mxu0 %v191_v30  ;;  %1044 = vmatmul.mubr.f32.gmra.mrb[24].mxu1 %v188_v27 }
  0xaa   : > { %401 = vmatprep.mubr.f32.mxu0 %v1361_v0  ;;  %1046 = vmatprep.mubr.f32.mxu1 %v189_v28 }
  0xad   : > { %402 = vmatmul.mubr.f32.gmra.mrb[26].mxu0 %v192_v31  ;;  %1047 = vmatmul.mubr.f32.gmra.mrb[26].mxu1 %v190_v29 }
  0xae   : > { %407 = vmatprep.mubr.f32.mxu0 %v1361_v0  ;;  %1049 = vmatprep.mubr.f32.mxu1 %v191_v30 }
  0xb1   : > { %408 = vmatmul.mubr.f32.gmra.mrb[28].mxu0 %v193_v32  ;;  %1050 = vmatmul.mubr.f32.gmra.mrb[28].mxu1 %v192_v31 }
  0xb2   : > { %413 = vmatprep.mubr.f32.mxu0 %v1361_v0  ;;  %1052 = vmatprep.mubr.f32.mxu1 %v193_v32 }
  0xb5   : > { %414 = vmatmul.mubr.f32.gmra.mrb[30].mxu0 %v194_v33  ;;  %1053 = vmatmul.mubr.f32.gmra.mrb[30].mxu1 %v194_v33 }
  0xb6   : > { %419 = vmatprep.mubr.f32.mxu0 %v1361_v0  ;;  %1055 = vmatprep.mubr.f32.mxu1 %v195_v34 }
  0xb9   : > { %420 = vmatmul.mubr.f32.gmra.mrb[32].mxu0 %v195_v34  ;;  %1056 = vmatmul.mubr.f32.gmra.mrb[32].mxu1 %v196_v35 }
  0xba   : > { %425 = vmatprep.mubr.f32.mxu0 %v1361_v0  ;;  %1058 = vmatprep.mubr.f32.mxu1 %v197_v36 }
  0xbd   : > { %426 = vmatmul.mubr.f32.gmra.mrb[34].mxu0 %v196_v35  ;;  %1059 = vmatmul.mubr.f32.gmra.mrb[34].mxu1 %v198_v37 }
  0xbe   : > { %431 = vmatprep.mubr.f32.mxu0 %v1361_v0  ;;  %1061 = vmatprep.mubr.f32.mxu1 %v199_v38 }
  0xc1   : > { %432 = vmatmul.mubr.f32.gmra.mrb[36].mxu0 %v197_v36  ;;  %1062 = vmatmul.mubr.f32.gmra.mrb[36].mxu1 %v200_v39 }
  0xc2   : > { %437 = vmatprep.mubr.f32.mxu0 %v1361_v0  ;;  %1064 = vmatprep.mubr.f32.mxu1 %v201_v40 }
  0xc5   : > { %438 = vmatmul.mubr.f32.gmra.mrb[38].mxu0 %v198_v37  ;;  %1065 = vmatmul.mubr.f32.gmra.mrb[38].mxu1 %v202_v41 }
  0xc6   : > { %443 = vmatprep.mubr.f32.mxu0 %v1361_v0  ;;  %1067 = vmatprep.mubr.f32.mxu1 %v1539_v55 }
  0xc9   : > { %444 = vmatmul.mubr.f32.gmra.mrb[40].mxu0 %v199_v38  ;;  %1068 = vmatmul.mubr.f32.gmra.mrb[40].mxu1 %v1548_v60 }
  0xca   : > { %449 = vmatprep.mubr.f32.mxu0 %v1361_v0  ;;  %1070 = vmatprep.mubr.f32.mxu1 %v1558_v2 }
  0xcd   : > { %450 = vmatmul.mubr.f32.gmra.mrb[42].mxu0 %v200_v39  ;;  %1071 = vmatmul.mubr.f32.gmra.mrb[42].mxu1 %v1566_v7 }
  0xce   : > { %455 = vmatprep.mubr.f32.mxu0 %v1361_v0  ;;  %1073 = vmatprep.mubr.f32.mxu1 %v1573_v12 }
  0xd1   : > { %456 = vmatmul.mubr.f32.gmra.mrb[44].mxu0 %v201_v40  ;;  %1074 = vmatmul.mubr.f32.gmra.mrb[44].mxu1 %v1580_v17 }
  0xd2   : > { %461 = vmatprep.mubr.f32.mxu0 %v1361_v0  ;;  %1076 = vmatprep.mubr.f32.mxu1 %v1587_v22 }
  0xd5   : > { %462 = vmatmul.mubr.f32.gmra.mrb[46].mxu0 %v202_v41  ;;  %1077 = vmatmul.mubr.f32.gmra.mrb[46].mxu1 %v1594_v25 }
 0x14c   : > { %v325_v42 = vpop.f32.mrb[0].mxu0  ;;  %v469_v43 = vpop.f32.mrb[0].mxu1 }
 0x14d   : > { %741 = vst [vmem:[%s1642_s17] sm:$0xff] %v325_v42  ;;  %813 = vst [vmem:[%s1642_s17 + $0x240] sm:$0xff] %v469_v43  ;;  %v327_v0 = vpop.f32.mrb[1].mxu0  ;;  %v471_v44 = vpop.f32.mrb[1].mxu1 }
 0x14e   : > { %742 = vst [vmem:[%s1642_s17 + $0x8] sm:$0xff] %v327_v0  ;;  %814 = vst [vmem:[%s1642_s17 + $0x248] sm:$0xff] %v471_v44 }
 0x150   : > { %v331_v45 = vpop.f32.mrb[2].mxu0  ;;  %v475_v46 = vpop.f32.mrb[2].mxu1 }
 0x151   : > { %744 = vst [vmem:[%s1642_s17 + $0x18] sm:$0xff] %v331_v45  ;;  %816 = vst [vmem:[%s1642_s17 + $0x258] sm:$0xff] %v475_v46  ;;  %v333_v47 = vpop.f32.mrb[3].mxu0  ;;  %v477_v48 = vpop.f32.mrb[3].mxu1 }
 0x152   : > { %745 = vst [vmem:[%s1642_s17 + $0x20] sm:$0xff] %v333_v47  ;;  %817 = vst [vmem:[%s1642_s17 + $0x260] sm:$0xff] %v477_v48 }
 0x154   : > { %v337_v49 = vpop.f32.mrb[4].mxu0  ;;  %v481_v50 = vpop.f32.mrb[4].mxu1 }
 0x155   : > { %747 = vst [vmem:[%s1642_s17 + $0x30] sm:$0xff] %v337_v49  ;;  %819 = vst [vmem:[%s1642_s17 + $0x270] sm:$0xff] %v481_v50  ;;  %v339_v51 = vpop.f32.mrb[5].mxu0  ;;  %v483_v52 = vpop.f32.mrb[5].mxu1 }
 0x156   : > { %748 = vst [vmem:[%s1642_s17 + $0x38] sm:$0xff] %v339_v51  ;;  %820 = vst [vmem:[%s1642_s17 + $0x278] sm:$0xff] %v483_v52 }
 0x158   : > { %v343_v53 = vpop.f32.mrb[6].mxu0  ;;  %v487_v54 = vpop.f32.mrb[6].mxu1 }
 0x159   : > { %750 = vst [vmem:[%s1642_s17 + $0x48] sm:$0xff] %v343_v53  ;;  %822 = vst [vmem:[%s1642_s17 + $0x288] sm:$0xff] %v487_v54  ;;  %v345_v55 = vpop.f32.mrb[7].mxu0  ;;  %v489_v56 = vpop.f32.mrb[7].mxu1 }
 0x15a   : > { %751 = vst [vmem:[%s1642_s17 + $0x50] sm:$0xff] %v345_v55  ;;  %823 = vst [vmem:[%s1642_s17 + $0x290] sm:$0xff] %v489_v56 }
 0x15c   : > { %v349_v57 = vpop.f32.mrb[8].mxu0  ;;  %v493_v58 = vpop.f32.mrb[8].mxu1 }
 0x15d   : > { %753 = vst [vmem:[%s1642_s17 + $0x60] sm:$0xff] %v349_v57  ;;  %825 = vst [vmem:[%s1642_s17 + $0x2a0] sm:$0xff] %v493_v58  ;;  %v351_v59 = vpop.f32.mrb[9].mxu0  ;;  %v495_v60 = vpop.f32.mrb[9].mxu1 }
 0x15e   : > { %754 = vst [vmem:[%s1642_s17 + $0x68] sm:$0xff] %v351_v59  ;;  %826 = vst [vmem:[%s1642_s17 + $0x2a8] sm:$0xff] %v495_v60 }
 0x160   : > { %v355_v61 = vpop.f32.mrb[10].mxu0  ;;  %v499_v62 = vpop.f32.mrb[10].mxu1 }
 0x161   : > { %756 = vst [vmem:[%s1642_s17 + $0x78] sm:$0xff] %v355_v61  ;;  %828 = vst [vmem:[%s1642_s17 + $0x2b8] sm:$0xff] %v499_v62  ;;  %v357_v63 = vpop.f32.mrb[11].mxu0  ;;  %v501_v1 = vpop.f32.mrb[11].mxu1 }
 0x162   : > { %757 = vst [vmem:[%s1642_s17 + $0x80] sm:$0xff] %v357_v63  ;;  %829 = vst [vmem:[%s1642_s17 + $0x2c0] sm:$0xff] %v501_v1 }
 0x164   : > { %v361_v2 = vpop.f32.mrb[12].mxu0  ;;  %v505_v3 = vpop.f32.mrb[12].mxu1 }
 0x165   : > { %759 = vst [vmem:[%s1642_s17 + $0x90] sm:$0xff] %v361_v2  ;;  %831 = vst [vmem:[%s1642_s17 + $0x2d0] sm:$0xff] %v505_v3  ;;  %v363_v4 = vpop.f32.mrb[13].mxu0  ;;  %v507_v5 = vpop.f32.mrb[13].mxu1 }
 0x166   : > { %760 = vst [vmem:[%s1642_s17 + $0x98] sm:$0xff] %v363_v4  ;;  %832 = vst [vmem:[%s1642_s17 + $0x2d8] sm:$0xff] %v507_v5 }
 0x168   : > { %v367_v6 = vpop.f32.mrb[14].mxu0  ;;  %v511_v7 = vpop.f32.mrb[14].mxu1 }
 0x169   : > { %762 = vst [vmem:[%s1642_s17 + $0xa8] sm:$0xff] %v367_v6  ;;  %834 = vst [vmem:[%s1642_s17 + $0x2e8] sm:$0xff] %v511_v7  ;;  %v369_v8 = vpop.f32.mrb[15].mxu0  ;;  %v513_v9 = vpop.f32.mrb[15].mxu1 }
 0x16a   : > { %763 = vst [vmem:[%s1642_s17 + $0xb0] sm:$0xff] %v369_v8  ;;  %835 = vst [vmem:[%s1642_s17 + $0x2f0] sm:$0xff] %v513_v9 }
 0x16c   : > { %v373_v10 = vpop.f32.mrb[16].mxu0  ;;  %v1033_v11 = vpop.f32.mrb[16].mxu1 }
 0x16d   : > { %765 = vst [vmem:[%s1642_s17 + $0xc0] sm:$0xff] %v373_v10  ;;  %746 = vst [vmem:[%s1642_s17 + $0x28] sm:$0xff] %v1033_v11  ;;  %v375_v12 = vpop.f32.mrb[17].mxu0  ;;  %v582_v13 = vpop.f32.mrb[17].mxu1 }
 0x16e   : > { %766 = vst [vmem:[%s1642_s17 + $0xc8] sm:$0xff] %v375_v12  ;;  %743 = vst [vmem:[%s1642_s17 + $0x10] sm:$0xff] %v582_v13 }
 0x170   : > { %v379_v14 = vpop.f32.mrb[18].mxu0  ;;  %v1036_v15 = vpop.f32.mrb[18].mxu1 }
 0x171   : > { %768 = vst [vmem:[%s1642_s17 + $0xd8] sm:$0xff] %v379_v14  ;;  %752 = vst [vmem:[%s1642_s17 + $0x58] sm:$0xff] %v1036_v15  ;;  %v381_v16 = vpop.f32.mrb[19].mxu0  ;;  %v592_v17 = vpop.f32.mrb[19].mxu1 }
 0x172   : > { %769 = vst [vmem:[%s1642_s17 + $0xe0] sm:$0xff] %v381_v16  ;;  %749 = vst [vmem:[%s1642_s17 + $0x40] sm:$0xff] %v592_v17 }
 0x174   : > { %v385_v18 = vpop.f32.mrb[20].mxu0  ;;  %v1039_v19 = vpop.f32.mrb[20].mxu1 }
 0x175   : > { %771 = vst [vmem:[%s1642_s17 + $0xf0] sm:$0xff] %v385_v18  ;;  %758 = vst [vmem:[%s1642_s17 + $0x88] sm:$0xff] %v1039_v19  ;;  %v387_v20 = vpop.f32.mrb[21].mxu0  ;;  %v602_v21 = vpop.f32.mrb[21].mxu1 }
 0x176   : > { %772 = vst [vmem:[%s1642_s17 + $0xf8] sm:$0xff] %v387_v20  ;;  %755 = vst [vmem:[%s1642_s17 + $0x70] sm:$0xff] %v602_v21 }
 0x178   : > { %v391_v22 = vpop.f32.mrb[22].mxu0  ;;  %v1042_v23 = vpop.f32.mrb[22].mxu1 }
 0x179   : > { %774 = vst [vmem:[%s1642_s17 + $0x108] sm:$0xff] %v391_v22  ;;  %764 = vst [vmem:[%s1642_s17 + $0xb8] sm:$0xff] %v1042_v23  ;;  %v393_v24 = vpop.f32.mrb[23].mxu0  ;;  %v612_v25 = vpop.f32.mrb[23].mxu1 }
 0x17a   : > { %775 = vst [vmem:[%s1642_s17 + $0x110] sm:$0xff] %v393_v24  ;;  %761 = vst [vmem:[%s1642_s17 + $0xa0] sm:$0xff] %v612_v25 }
 0x17c   : > { %v397_v26 = vpop.f32.mrb[24].mxu0  ;;  %v1045_v27 = vpop.f32.mrb[24].mxu1 }
 0x17d   : > { %777 = vst [vmem:[%s1642_s17 + $0x120] sm:$0xff] %v397_v26  ;;  %770 = vst [vmem:[%s1642_s17 + $0xe8] sm:$0xff] %v1045_v27  ;;  %v399_v28 = vpop.f32.mrb[25].mxu0  ;;  %v622_v29 = vpop.f32.mrb[25].mxu1 }
 0x17e   : > { %778 = vst [vmem:[%s1642_s17 + $0x128] sm:$0xff] %v399_v28  ;;  %767 = vst [vmem:[%s1642_s17 + $0xd0] sm:$0xff] %v622_v29 }
 0x180   : > { %v403_v30 = vpop.f32.mrb[26].mxu0  ;;  %v1048_v31 = vpop.f32.mrb[26].mxu1 }
 0x181   : > { %780 = vst [vmem:[%s1642_s17 + $0x138] sm:$0xff] %v403_v30  ;;  %776 = vst [vmem:[%s1642_s17 + $0x118] sm:$0xff] %v1048_v31  ;;  %v405_v32 = vpop.f32.mrb[27].mxu0  ;;  %v632_v33 = vpop.f32.mrb[27].mxu1 }
 0x182   : > { %781 = vst [vmem:[%s1642_s17 + $0x140] sm:$0xff] %v405_v32  ;;  %773 = vst [vmem:[%s1642_s17 + $0x100] sm:$0xff] %v632_v33 }
 0x184   : > { %v409_v34 = vpop.f32.mrb[28].mxu0  ;;  %v1051_v35 = vpop.f32.mrb[28].mxu1 }
 0x185   : > { %783 = vst [vmem:[%s1642_s17 + $0x150] sm:$0xff] %v409_v34  ;;  %782 = vst [vmem:[%s1642_s17 + $0x148] sm:$0xff] %v1051_v35  ;;  %v411_v36 = vpop.f32.mrb[29].mxu0  ;;  %v642_v37 = vpop.f32.mrb[29].mxu1 }
 0x186   : > { %784 = vst [vmem:[%s1642_s17 + $0x158] sm:$0xff] %v411_v36  ;;  %779 = vst [vmem:[%s1642_s17 + $0x130] sm:$0xff] %v642_v37 }
 0x188   : > { %v415_v38 = vpop.f32.mrb[30].mxu0  ;;  %v1054_v39 = vpop.f32.mrb[30].mxu1 }
 0x189   : > { %786 = vst [vmem:[%s1642_s17 + $0x168] sm:$0xff] %v415_v38  ;;  %788 = vst [vmem:[%s1642_s17 + $0x178] sm:$0xff] %v1054_v39  ;;  %v417_v40 = vpop.f32.mrb[31].mxu0  ;;  %v652_v41 = vpop.f32.mrb[31].mxu1 }
 0x18a   : > { %787 = vst [vmem:[%s1642_s17 + $0x170] sm:$0xff] %v417_v40  ;;  %785 = vst [vmem:[%s1642_s17 + $0x160] sm:$0xff] %v652_v41 }
 0x18c   : > { %v421_v42 = vpop.f32.mrb[32].mxu0  ;;  %v1057_v43 = vpop.f32.mrb[32].mxu1 }
 0x18d   : > { %789 = vst [vmem:[%s1642_s17 + $0x180] sm:$0xff] %v421_v42  ;;  %794 = vst [vmem:[%s1642_s17 + $0x1a8] sm:$0xff] %v1057_v43  ;;  %v423_v0 = vpop.f32.mrb[33].mxu0  ;;  %v662_v44 = vpop.f32.mrb[33].mxu1 }
 0x18e   : > { %790 = vst [vmem:[%s1642_s17 + $0x188] sm:$0xff] %v423_v0  ;;  %791 = vst [vmem:[%s1642_s17 + $0x190] sm:$0xff] %v662_v44 }
 0x190   : > { %v427_v45 = vpop.f32.mrb[34].mxu0  ;;  %v1060_v46 = vpop.f32.mrb[34].mxu1 }
 0x191   : > { %792 = vst [vmem:[%s1642_s17 + $0x198] sm:$0xff] %v427_v45  ;;  %800 = vst [vmem:[%s1642_s17 + $0x1d8] sm:$0xff] %v1060_v46  ;;  %v429_v47 = vpop.f32.mrb[35].mxu0  ;;  %v672_v48 = vpop.f32.mrb[35].mxu1 }
 0x192   : > { %793 = vst [vmem:[%s1642_s17 + $0x1a0] sm:$0xff] %v429_v47  ;;  %797 = vst [vmem:[%s1642_s17 + $0x1c0] sm:$0xff] %v672_v48 }
 0x194   : > { %v433_v49 = vpop.f32.mrb[36].mxu0  ;;  %v1063_v50 = vpop.f32.mrb[36].mxu1 }
 0x195   : > { %795 = vst [vmem:[%s1642_s17 + $0x1b0] sm:$0xff] %v433_v49  ;;  %806 = vst [vmem:[%s1642_s17 + $0x208] sm:$0xff] %v1063_v50  ;;  %v435_v51 = vpop.f32.mrb[37].mxu0  ;;  %v682_v52 = vpop.f32.mrb[37].mxu1 }
 0x196   : > { %796 = vst [vmem:[%s1642_s17 + $0x1b8] sm:$0xff] %v435_v51  ;;  %803 = vst [vmem:[%s1642_s17 + $0x1f0] sm:$0xff] %v682_v52 }
 0x198   : > { %v439_v53 = vpop.f32.mrb[38].mxu0  ;;  %v1066_v54 = vpop.f32.mrb[38].mxu1 }
 0x199   : > { %798 = vst [vmem:[%s1642_s17 + $0x1c8] sm:$0xff] %v439_v53  ;;  %812 = vst [vmem:[%s1642_s17 + $0x238] sm:$0xff] %v1066_v54  ;;  %v441_v55 = vpop.f32.mrb[39].mxu0  ;;  %v692_v56 = vpop.f32.mrb[39].mxu1 }
 0x19a   : > { %799 = vst [vmem:[%s1642_s17 + $0x1d0] sm:$0xff] %v441_v55  ;;  %809 = vst [vmem:[%s1642_s17 + $0x220] sm:$0xff] %v692_v56 }
 0x19c   : > { %v445_v57 = vpop.f32.mrb[40].mxu0  ;;  %v1069_v58 = vpop.f32.mrb[40].mxu1 }
 0x19d   : > { %801 = vst [vmem:[%s1642_s17 + $0x1e0] sm:$0xff] %v445_v57  ;;  %818 = vst [vmem:[%s1642_s17 + $0x268] sm:$0xff] %v1069_v58  ;;  %v447_v59 = vpop.f32.mrb[41].mxu0  ;;  %v702_v60 = vpop.f32.mrb[41].mxu1 }
 0x19e   : > { %802 = vst [vmem:[%s1642_s17 + $0x1e8] sm:$0xff] %v447_v59  ;;  %815 = vst [vmem:[%s1642_s17 + $0x250] sm:$0xff] %v702_v60 }
 0x1a0   : > { %v451_v61 = vpop.f32.mrb[42].mxu0  ;;  %v1072_v62 = vpop.f32.mrb[42].mxu1 }
 0x1a1   : > { %804 = vst [vmem:[%s1642_s17 + $0x1f8] sm:$0xff] %v451_v61  ;;  %824 = vst [vmem:[%s1642_s17 + $0x298] sm:$0xff] %v1072_v62  ;;  %v453_v63 = vpop.f32.mrb[43].mxu0  ;;  %v712_v1 = vpop.f32.mrb[43].mxu1 }
 0x1a2   : > { %805 = vst [vmem:[%s1642_s17 + $0x200] sm:$0xff] %v453_v63  ;;  %821 = vst [vmem:[%s1642_s17 + $0x280] sm:$0xff] %v712_v1 }
 0x1a4   : > { %v457_v2 = vpop.f32.mrb[44].mxu0  ;;  %v1075_v3 = vpop.f32.mrb[44].mxu1 }
 0x1a5   : > { %807 = vst [vmem:[%s1642_s17 + $0x210] sm:$0xff] %v457_v2  ;;  %830 = vst [vmem:[%s1642_s17 + $0x2c8] sm:$0xff] %v1075_v3  ;;  %v459_v4 = vpop.f32.mrb[45].mxu0  ;;  %v722_v5 = vpop.f32.mrb[45].mxu1 }
 0x1a6   : > { %808 = vst [vmem:[%s1642_s17 + $0x218] sm:$0xff] %v459_v4  ;;  %827 = vst [vmem:[%s1642_s17 + $0x2b0] sm:$0xff] %v722_v5 }
 0x1a8   : > { %v463_v6 = vpop.f32.mrb[46].mxu0  ;;  %v1078_v7 = vpop.f32.mrb[46].mxu1 }
 0x1a9   : > { %810 = vst [vmem:[%s1642_s17 + $0x228] sm:$0xff] %v463_v6  ;;  %836 = vst [vmem:[%s1642_s17 + $0x2f8] sm:$0xff] %v1078_v7  ;;  %v465_v8 = vpop.f32.mrb[47].mxu0  ;;  %v732_v9 = vpop.f32.mrb[47].mxu1 }
 0x1aa   : > { %811 = vst [vmem:[%s1642_s17 + $0x230] sm:$0xff] %v465_v8  ;;  %833 = vst [vmem:[%s1642_s17 + $0x2e0] sm:$0xff] %v732_v9 }
 0x1ab   : > { %1296 = shalt.err (!%p1293_p7)
}
 0x1ac   : > { %s1297_s24 = scalar_lea.hbm %s1741_s4, 12288  ;;  %s1301_s26 = scalar_lea.hbm %s1793_s2, 24576 }
 0x1ad   : > { %p1298_p9 = scmp.ne.s32.totalorder %s1741_s4, %s1297_s24  ;;  %p1302_p5 = scmp.lt.u32.totalorder %s1741_s4, %s1793_s2 }
 0x1ae   : > { %p1303_p11 = scmp.lt.u32.totalorder %s1301_s26, %s1297_s24  ;;  %p1305_p4 = scmp.lt.u32.totalorder %s1297_s24, %s1741_s4 }
 0x1af   : > { %p1299_p2 = pnand %p1298_p9, %p1471_p12 }
 0x1b0   : > { %p1304_p1 = por %p1303_p11, %p1302_p5 }
 0x1b1   : > { %p1300_p0 = pneg %p1299_p2 }
 0x1b2   : > { %p1306_p6 = por %p1305_p4, %p1304_p1 }
 0x1b4   : > { %p1307_p8 = pnand %p1306_p6, %p1300_p0 }
 0x1b6   : > { %1310 = shalt.err (!%p1307_p8)
}
 0x1b7   : > { %s1363_s3 = smov 384   ;;  %s1364_s15 = smov 24  }
 0x1b8   : > { %1167 = dma.vmem_to_hbm [thread:$0]  (%p1471_p12), %s1743_s22, 12288, %s1741_s4, %s838_s13, %s1363_s3, %s1363_s3, %s1364_s15  }
 0x1b9 PF: > { %s867_s17 = sand.u32 1, %s1341_s9   ;;  %p1808_p10 = scmp.ne.s32.totalorder %s1798_s16, 0 }
 0x1ba   : > { %p1809_p13 = scmp.ge.s32.totalorder %s1353_s12, 2  ;;  %s868_s27 = scalar_lea.sflag [#allocation4], %s867_s17 }
 0x1bc   : > { %p1178_p3 = pnand %p1809_p13, %p1808_p10 }
 0x1be   : > { %1336 = dma.done.wait (!%p1178_p3), %s868_s27, 12288  }
 0x1bf   : > { %1338 = vsyncadd (!%p1178_p3), %s868_s27, 4294955008  ;;  %p16_p7 = scmp.ge.s32.totalorder %s1436_s21, 4   ;;  %s1810_s9 = smov %s1345_s10 }
 0x1c0   : > { %s1811_s10 = smov %s1349_s11  ;;  %s1812_s11 = smov %s1467_s8 }
 0x1c1   : > { %s1813_s12 = smov %s1436_s21  ;;  %18 = sbr.rel (!%p16_p7) target bundleno = 6 (0x6), region = 77 }
 0x1c8   :  { %873 = vsyncpa [#allocation3], 1 }
 0x1c9   :  { %875 = vsyncpa [#allocation3 + $0x1], 1 }
 0x1ca   :  { %876 = vsyncpa [#allocation6], 1 }
 0x1cb   :  { %877 = vsyncpa [#allocation4], 1 }
 0x1cc   :  { %879 = vsyncpa [#allocation4 + $0x1], 1 }

</bundles_post_ra>
